<compile_context>
chip_gen: v7x
topology: tpu7x:2x2x1
jax: 0.10.0
libtpu: 0.0.40
codegen_flags: <defaults>
</compile_context>

<pallas_src>
import functools

import jax
import jax.numpy as jnp
from jax.experimental import pallas as pl
from jax.experimental.pallas import tpu as pltpu


def _affine_coupling_kernel(x_ref, w1_ref, b1_ref, w2_ref, b2_ref, out_ref, *,
                            d, mm_dtype):
    """One batch tile, natural batch-major layout.

    x_ref  : (TB, D)      input tile (batch rows on sublanes, features on lanes)
    w1_ref : (d, H)       hidden-layer weight       b1_ref : (1, H)
    w2_ref : (H, 2*Dd)    fused [s | t] head weight b2_ref : (1, 2*Dd)
    out_ref: (TB, D)      output tile = [x_fix | x_change*exp(s)+t]
    """
    D = x_ref.shape[1]
    Dd = D - d

    x = x_ref[...]                                  # (TB, D) f32
    xf = x[:, :d]                                   # (TB, d)   pass-through half
    xc = x[:, d:]                                   # (TB, Dd)  transformed half

    # Hidden layer: MXU matmul with f32 accumulation, tanh on the EUP (f32).
    h = jnp.tanh(
        jnp.dot(xf.astype(mm_dtype), w1_ref[...],
                preferred_element_type=jnp.float32)
        + b1_ref[...])                              # (TB, H)

    # Fused s|t head: a single MXU pass producing (TB, 2*Dd); slice in vregs.
    st = (jnp.dot(h.astype(mm_dtype), w2_ref[...],
                  preferred_element_type=jnp.float32)
          + b2_ref[...])                            # (TB, 2*Dd)
    s = st[:, :Dd]
    t = st[:, Dd:]

    # Affine coupling (exp on EUP, multiply-add on VPU, all f32) and a single
    # full-row store: [pass-through | transformed].
    y_change = xc * jnp.exp(s) + t
    out_ref[...] = jnp.concatenate([xf, y_change], axis=1).astype(out_ref.dtype)


def _round_up(v, m):
    return ((v + m - 1) // m) * m


def affine_coupling_forward(x, w1, b1, w2, b2, d, *,
                            batch_tile=1024, matmul_dtype=jnp.float32):
    """AffineCouplingLayer.forward.

    x  : (N, D)
    w1 : (d, H),        b1 : (1, H)         -- hidden layer of the coupling net
    w2 : (H, 2*(D-d)),  b2 : (1, 2*(D-d))   -- fused [s | t] output head
    matmul_dtype : dtype of the MXU operands (float32 or bfloat16); the
                   accumulation and all elementwise math stay in float32.
    """
    N, D = x.shape
    H = w1.shape[1]
    Dd = D - d
    assert 0 < d < D
    assert w1.shape == (d, H)
    assert w2.shape == (H, 2 * Dd)

    # --- weight/bias preprocessing (tiny, grid-invariant arrays) -------------
    w1_p = w1.astype(matmul_dtype)                         # (d, H)
    w2_p = w2.astype(matmul_dtype)                         # (H, 2*Dd) fused s|t
    b1_p = jnp.asarray(b1, jnp.float32).reshape(1, H)
    b2_p = jnp.asarray(b2, jnp.float32).reshape(1, 2 * Dd)

    # --- batch tiling: multiples of 8 sublanes, large tiles, >= 2 grid steps -
    tile = min(int(batch_tile), _round_up(N, 8))
    tile = max(8, (tile // 8) * 8)
    if N > 8 and pl.cdiv(N, tile) < 2:
        # v7x has 2 TensorCores; a "parallel" grid needs >= 2 steps to use both.
        tile = max(8, _round_up(pl.cdiv(N, 2), 8))
    grid = (pl.cdiv(N, tile),)

    # --- VMEM budget from the actual footprint, capped under v7x's 64 MiB ----
    itemsize = jnp.dtype(x.dtype).itemsize
    io_bytes = 2 * 2 * tile * D * itemsize                     # in/out tiles, double-buffered
    weight_bytes = 2 * 4 * (d * H + H + H * 2 * Dd + 2 * Dd)   # weights/biases (buffered)
    interm_bytes = 4 * tile * (H + 2 * Dd + 2 * D)             # h / st / temporaries
    vmem_limit = int(min(max(2 * (io_bytes + weight_bytes + interm_bytes),
                             16 * 1024 * 1024),
                         48 * 1024 * 1024))

    kernel = functools.partial(_affine_coupling_kernel, d=d, mm_dtype=matmul_dtype)

    # NOTE: for production-sized weights on v7x, the grid-invariant weight
    # BlockSpecs could additionally use pipeline_mode=pl.Buffered(1) to avoid
    # double-buffering them; irrelevant at these shapes, so omitted.
    grid_spec = pltpu.PrefetchScalarGridSpec(
        num_scalar_prefetch=0,
        grid=grid,
        in_specs=[
            pl.BlockSpec((tile, D), lambda i: (i, 0)),        # x tile (batch-major)
            pl.BlockSpec((d, H), lambda i: (0, 0)),           # w1 (replicated)
            pl.BlockSpec((1, H), lambda i: (0, 0)),           # b1
            pl.BlockSpec((H, 2 * Dd), lambda i: (0, 0)),      # w2 fused [s|t]
            pl.BlockSpec((1, 2 * Dd), lambda i: (0, 0)),      # b2 fused [s|t]
        ],
        out_specs=pl.BlockSpec((tile, D), lambda i: (i, 0)),  # full output row
    )

    return pl.pallas_call(
        kernel,
        out_shape=jax.ShapeDtypeStruct((N, D), x.dtype),
        grid_spec=grid_spec,
        compiler_params=pltpu.CompilerParams(
            dimension_semantics=("parallel",),
            vmem_limit_bytes=vmem_limit,
        ),
    )(x, w1_p, b1_p, w2_p, b2_p)


def _reference_forward(x, w1, b1, w2, b2, d):
    """Pure-JAX reference mirroring the PyTorch module semantics."""
    x_fix, x_change = x[:, :d], x[:, d:]
    h = jnp.tanh(x_fix @ w1 + b1)
    st = h @ w2 + b2
    Dd = x.shape[1] - d
    s, t = st[:, :Dd], st[:, Dd:]
    y_change = x_change * jnp.exp(s) + t
    return jnp.concatenate([x_fix, y_change], axis=1)


if __name__ == "__main__":
    # Small shapes consistent with the module's (n_sample, D) interface.
    N, D, d, H = 16, 8, 4, 32

    key = jax.random.PRNGKey(0)
    kx, k1, k2, k3, k4 = jax.random.split(key, 5)

    x = jax.random.normal(kx, (N, D), dtype=jnp.float32)

    # Deterministic synthetic parameters for the coupling net (stand-in MLP).
    w1 = 0.1 * jax.random.normal(k1, (d, H), dtype=jnp.float32)
    b1 = 0.1 * jax.random.normal(k2, (1, H), dtype=jnp.float32)
    w2 = 0.1 * jax.random.normal(k3, (H, 2 * (D - d)), dtype=jnp.float32)
    b2 = 0.1 * jax.random.normal(k4, (1, 2 * (D - d)), dtype=jnp.float32)

    y_ref = _reference_forward(x, w1, b1, w2, b2, d)

    # f32 path (exact module semantics).
    y = jax.block_until_ready(affine_coupling_forward(x, w1, b1, w2, b2, d))
    assert jnp.allclose(y, y_ref, atol=1e-5, rtol=1e-5), float(
        jnp.max(jnp.abs(y - y_ref)))
    # The fixed half must be passed through untouched.
    assert bool(jnp.array_equal(y[:, :d], x[:, :d]))

    # Ragged batch (exercises the masked last grid block, no wrapper padding).
    xr = x[:13]
    yr = jax.block_until_ready(affine_coupling_forward(xr, w1, b1, w2, b2, d))
    yr_ref = _reference_forward(xr, w1, b1, w2, b2, d)
    assert jnp.allclose(yr, yr_ref, atol=1e-5, rtol=1e-5)

    # bf16-MXU path (f32 accumulation / f32 elementwise) -- looser tolerance.
    y_bf = jax.block_until_ready(
        affine_coupling_forward(x, w1, b1, w2, b2, d, matmul_dtype=jnp.bfloat16))
    assert jnp.allclose(y_bf, y_ref, atol=3e-2, rtol=3e-2)

    print("KERNEL_OK")
</pallas_src>

<mosaic_0001>
module attributes {stable_mosaic.version = 11 : i64} {
  func.func @_affine_coupling_kernel(%arg0: i32, %arg1: memref<8x8xf32, #tpu.memory_space<vmem>>, %arg2: memref<4x32xf32, #tpu.memory_space<vmem>>, %arg3: memref<1x32xf32, #tpu.memory_space<vmem>>, %arg4: memref<32x8xf32, #tpu.memory_space<vmem>>, %arg5: memref<1x8xf32, #tpu.memory_space<vmem>>, %arg6: memref<8x8xf32, #tpu.memory_space<vmem>>) attributes {dimension_semantics = [#tpu.dimension_semantics<parallel>], iteration_bounds = array<i64: 2>, scalar_prefetch = 0 : i64, scratch_operands = 0 : i64, tpu.core_type = #tpu.core_type<tc>, window_params = [{transform_indices = @transform_0, window_bounds = array<i64: 8, 8>}, {pipeline_mode = #tpu.pipeline_mode<synchronous>, transform_indices = @transform_1, window_bounds = array<i64: 4, 32>}, {pipeline_mode = #tpu.pipeline_mode<synchronous>, transform_indices = @transform_2, window_bounds = array<i64: 1, 32>}, {pipeline_mode = #tpu.pipeline_mode<synchronous>, transform_indices = @transform_3, window_bounds = array<i64: 32, 8>}, {pipeline_mode = #tpu.pipeline_mode<synchronous>, transform_indices = @transform_4, window_bounds = array<i64: 1, 8>}, {transform_indices = @transform_5, window_bounds = array<i64: 8, 8>}]} {
    %c0 = arith.constant 0 : index
    %c0_0 = arith.constant 0 : index
    %0 = vector.load %arg1[%c0, %c0_0] : memref<8x8xf32, #tpu.memory_space<vmem>>, vector<8x8xf32>
    %1 = vector.extract_strided_slice %0 {offsets = [0, 0], sizes = [8, 4], strides = [1, 1]} : vector<8x8xf32> to vector<8x4xf32>
    %2 = vector.extract_strided_slice %0 {offsets = [0, 4], sizes = [8, 4], strides = [1, 1]} : vector<8x8xf32> to vector<8x4xf32>
    %c0_1 = arith.constant 0 : index
    %c0_2 = arith.constant 0 : index
    %3 = vector.load %arg2[%c0_1, %c0_2] : memref<4x32xf32, #tpu.memory_space<vmem>>, vector<4x32xf32>
    %cst = arith.constant dense<0.000000e+00> : vector<8x32xf32>
    %4 = tpu.matmul %1, %3, %cst {dimension_numbers = #tpu.dot_dimension_numbers<[1], [0], [0], [1], [0, 0, 1, 1], [], []>} : vector<8x4xf32>, vector<4x32xf32>, vector<8x32xf32> -> vector<8x32xf32>
    %c0_3 = arith.constant 0 : index
    %c0_4 = arith.constant 0 : index
    %5 = vector.load %arg3[%c0_3, %c0_4] : memref<1x32xf32, #tpu.memory_space<vmem>>, vector<1x32xf32>
    %6 = vector.broadcast %5 : vector<1x32xf32> to vector<8x32xf32>
    %7 = arith.addf %4, %6 : vector<8x32xf32>
    %8 = math.tanh %7 : vector<8x32xf32>
    %c0_5 = arith.constant 0 : index
    %c0_6 = arith.constant 0 : index
    %9 = vector.load %arg4[%c0_5, %c0_6] : memref<32x8xf32, #tpu.memory_space<vmem>>, vector<32x8xf32>
    %cst_7 = arith.constant dense<0.000000e+00> : vector<8x8xf32>
    %10 = tpu.matmul %8, %9, %cst_7 {dimension_numbers = #tpu.dot_dimension_numbers<[1], [0], [0], [1], [0, 0, 1, 1], [], []>} : vector<8x32xf32>, vector<32x8xf32>, vector<8x8xf32> -> vector<8x8xf32>
    %c0_8 = arith.constant 0 : index
    %c0_9 = arith.constant 0 : index
    %11 = vector.load %arg5[%c0_8, %c0_9] : memref<1x8xf32, #tpu.memory_space<vmem>>, vector<1x8xf32>
    %12 = vector.broadcast %11 : vector<1x8xf32> to vector<8x8xf32>
    %13 = arith.addf %10, %12 : vector<8x8xf32>
    %14 = vector.extract_strided_slice %13 {offsets = [0, 0], sizes = [8, 4], strides = [1, 1]} : vector<8x8xf32> to vector<8x4xf32>
    %15 = vector.extract_strided_slice %13 {offsets = [0, 4], sizes = [8, 4], strides = [1, 1]} : vector<8x8xf32> to vector<8x4xf32>
    %16 = math.exp %14 : vector<8x4xf32>
    %17 = arith.mulf %2, %16 : vector<8x4xf32>
    %18 = arith.addf %17, %15 : vector<8x4xf32>
    %19 = tpu.concatenate %1, %18 in 1 : vector<8x4xf32>, vector<8x4xf32> -> vector<8x8xf32>
    %c0_10 = arith.constant 0 : index
    %c0_11 = arith.constant 0 : index
    %20 = vector.load %arg6[%c0_10, %c0_11] : memref<8x8xf32, #tpu.memory_space<vmem>>, vector<8x8xf32>
    tpu.vector_store %arg6[%c0_10, %c0_11], %19 {strides = array<i32>} : memref<8x8xf32, #tpu.memory_space<vmem>>, vector<8x8xf32>,
    return
  }
  func.func @transform_0(%arg0: i32) -> (i32, i32) {
    %c0_i32 = arith.constant 0 : i32
    %c0_i32_0 = arith.constant 0 : i32
    return %arg0, %c0_i32 : i32, i32
  }
  func.func @transform_1(%arg0: i32) -> (i32, i32) {
    %c0_i32 = arith.constant 0 : i32
    %c0_i32_0 = arith.constant 0 : i32
    %c0_i32_1 = arith.constant 0 : i32
    return %c0_i32, %c0_i32_0 : i32, i32
  }
  func.func @transform_2(%arg0: i32) -> (i32, i32) {
    %c0_i32 = arith.constant 0 : i32
    %c0_i32_0 = arith.constant 0 : i32
    %c0_i32_1 = arith.constant 0 : i32
    return %c0_i32, %c0_i32_0 : i32, i32
  }
  func.func @transform_3(%arg0: i32) -> (i32, i32) {
    %c0_i32 = arith.constant 0 : i32
    %c0_i32_0 = arith.constant 0 : i32
    %c0_i32_1 = arith.constant 0 : i32
    return %c0_i32, %c0_i32_0 : i32, i32
  }
  func.func @transform_4(%arg0: i32) -> (i32, i32) {
    %c0_i32 = arith.constant 0 : i32
    %c0_i32_0 = arith.constant 0 : i32
    %c0_i32_1 = arith.constant 0 : i32
    return %c0_i32, %c0_i32_0 : i32, i32
  }
  func.func @transform_5(%arg0: i32) -> (i32, i32) {
    %c0_i32 = arith.constant 0 : i32
    %c0_i32_0 = arith.constant 0 : i32
    return %arg0, %c0_i32 : i32, i32
  }
}

</mosaic_0001>

<bundles_post_ra>
// kernel: tpu_custom_call.1
= control target key start
LH: loop header
LB: loop body
LE: loop exit
PB: predicated region body
PF: predicated region fallthrough
CT: control target
= control target key end

     0   :  { %s558_s18 = smov 0   ;;  %s605_s0 = inlined_call_operand.vmem [shape: f32[16,8], index: 0, kind: input, shape index: {}]   ;;  %s606_s1 = inlined_call_operand.vmem [shape: f32[4,32], index: 1, kind: input, shape index: {}]   ;;  %s607_s2 = inlined_call_operand.vmem [shape: f32[1,32], index: 2, kind: input, shape index: {}]   ;;  %s608_s3 = inlined_call_operand.vmem [shape: f32[32,8], index: 3, kind: input, shape index: {}]   ;;  %s609_s4 = inlined_call_operand.vmem [shape: f32[1,8], index: 4, kind: input, shape index: {}]   ;;  %s610_s5 = inlined_call_operand.vmem [shape: f32[16,8], index: 5, kind: output, shape index: {}]  }
   0x1 LB: > { %s457_s19 = sadd.s32 4294967295, %s522_s18   ;;  %p461_p0 = scmp.ge.s32.totalorder %s522_s18, 1  ;;  %s522_s18 = sphi %s558_s18, %s15_s18  }
   0x2   : > { %p186_p1 = scmp.lt.s32.totalorder %s522_s18, 3 }
   0x4   : > { %p187_p2 = pnand %p461_p0, %p186_p1 }
   0x5   : > { %v221_v0 = vld [vmem:[%s606_s1] sm:$0xf] (!%p187_p2)  ;;  %vm233_vm0 = vcmask (!%p187_p2), 1043456   ;;  %p212_p3 = scmp.lt.s32.totalorder (!%p187_p2), %s457_s19, 1  ;;  %v524_v1 = vmov (!%p187_p2), 0.0   ;;  %vm525_vm1 = vmmov (!%p187_p2), 0  }
   0x6   : > { %190 = sbr.rel (%p187_p2) target bundleno = 590 (0x24e), region = 40  ;;  %478 = vmatprep.subr.mxu0 (!%p187_p2), %v524_v1  ;;  %480 = vmatprep.mubr.msk.f32.mxu0 (!%p187_p2), %vm525_vm1, %v524_v1  ;;  %vm229_vm2 = vcmask (!%p187_p2), 31744   ;;  %v308_v3 = vld [vmem:[%s608_s3] sm:$0xff] (!%p187_p2)  ;;  %v309_v4 = vld [vmem:[%s608_s3 + $0x8] sm:$0xff] (!%p187_p2)  ;;  %v310_v5 = vld [vmem:[%s608_s3 + $0x10] sm:$0xff] (!%p187_p2)  ;;  %v526_v6 = vmov (!%p187_p2), 0.0|0.0  }
   0x7   : > { %479 = vmatpush3.msk.msra.mxu0 (!%p187_p2), %vm233_vm0, %v221_v0  ;;  %491 = vmatprep.mubr.msk.f32.mxu1 (!%p187_p2), %vm525_vm1, %v524_v1  ;;  %v495_v7 = vpack.c.bf16 (!%p187_p2), %v309_v4, %v308_v3  ;;  %v311_v8 = vld [vmem:[%s608_s3 + $0x18] sm:$0xff] (!%p187_p2)  ;;  %v464_v10 = vld [vmem:[%s607_s2] ss:$0 sm:$0xff] (!%p187_p2)  ;;  %vm319_vm3 = vcmask (!%p187_p2), 261120   ;;  %s527_s13 = smov (!%p187_p2), 4   ;;  %vm402_vm4 = vcmask (!%p187_p2), 64512  }
   0x8   : > { %494 = vmatprep.subr.bf16.mxu1 (!%p187_p2), %v526_v6  ;;  %v498_v9 = vpack.c.bf16 (!%p187_p2), %v311_v8, %v310_v5  ;;  %v467_v15 = vld [vmem:[%s609_s4] ss:$0 sm:$0xff] (!%p187_p2) }
   0x9   : > { %496 = vmatpush3.bf16.msra.mxu1 (!%p187_p2), %v495_v7 }
   0xa   : > { %497 = vmatprep.subr.bf16.mxu1 (!%p187_p2), %v526_v6 }
   0xd   : > { %s612_s19 = smov (!%p212_p3, %s457_s19), 1  ;;  %499 = vmatpush3.bf16.msra.mxu1 %v498_v9 }
   0xe   : > { %s462_s22 = sshll.u32 %s612_s19, 3 }
   0xf   : > { %s215_s25 = scalar_lea.vmem %s605_s0, %s462_s22  ;;  %s219_s16 = scalar_lea.vmem %s610_s5, %s462_s22 }
  0x10   : > { %v220_v2 = vld [vmem:[%s215_s25] sm:$0xff] }
  0x11   : > { %481 = vmatmul.mubr.msk.f32.vlgmr.msra.gmra.mrb[0].mxu0 %vm229_vm2, %v220_v2 }
  0xe4   : > { %v303_v11 = vpop.f32.mrb[0].mxu0 }
  0xe5   : > { %v304_v12 = vadd.f32 %v464_v10, %v303_v11  ;;  %v482_v13 = vpop.f32.mrb[1].mxu0 }
  0xe7   : > { %512 = vtanh.f32 %v304_v12 }
  0xf1   : > { %v513_v14 = vpop.eup %512 }
  0xf2   : > { %492 = vmatmul.mubr.msk.f32.vlgmr.msra.gmra.mrb[0].mxu1 %vm319_vm3, %v513_v14 }
 0x1c5   : > { %v389_v16 = vpop.f32.mrb[0].mxu1 }
 0x1c6   : > { %v390_v17 = vadd.f32 %v467_v15, %v389_v16  ;;  %v493_v18 = vpop.f32.mrb[1].mxu1 }
 0x1c8   : > { %v393_v19 = vmul.f32 1.442695, %v390_v17 }
 0x1ca   : > { %514 = vpow2.f32 %v393_v19 }
 0x1d4   : > { %v515_v20 = vpop.eup %514 }
 0x1d5   : > { %396 = vrot.lane.b32.xlu0 %v515_v20, %s527_s13 }
 0x247   : > { %v397_v21 = vpop.permute.xlu0 %396 }
 0x248   : > { %v399_v22 = vmul.f32 %v397_v21, %v220_v2 }
 0x24a   : > { %v400_v23 = vadd.f32 %v399_v22, %v390_v17 }
 0x24c   : > { %v401_v24 = vsel %vm229_vm2, %v220_v2, %v400_v23 }
 0x24d   : > { %403 = vst.msk [vmem:[%s219_s16] sm:$0xff] %vm402_vm4, %v401_v24 }
 0x24e PF: > { %s15_s18 = sadd.s32 1, %s522_s18  }
 0x24f   : > { %p12_p4 = scmp.ge.s32.totalorder %s15_s18, 4  }
 0x251   :  { %14 = sbr.rel (!%p12_p4) target bundleno = 1 (0x1), region = 70 }

</bundles_post_ra>
